<compile_context>
chip_gen: v6e
topology: v6e:2x2x1
jax: 0.10.0
libtpu: 0.0.40
codegen_flags: <defaults>
</compile_context>

<pallas_src>
import functools

import jax
import jax.numpy as jnp
from jax.experimental import pallas as pl
from jax.experimental.pallas import tpu as pltpu


def _round_up(x, m):
    return ((x + m - 1) // m) * m


_HAS_BUFFERED = hasattr(pl, "Buffered")


def _const_spec(shape):
    """BlockSpec for a grid-invariant operand (single-buffered when supported)."""
    nd = len(shape)
    idx = lambda i, p, _nd=nd: (0,) * _nd
    if _HAS_BUFFERED:
        try:
            return pl.BlockSpec(shape, idx, pipeline_mode=pl.Buffered(1))
        except Exception:          # older jax without pipeline_mode support
            pass
    return pl.BlockSpec(shape, idx)


# -----------------------------------------------------------------------------
# Fused ConvFC coarse-head kernel (+ fused calculate_uncertainty epilogue)
# -----------------------------------------------------------------------------
def _convfc_kernel(x_ref, cls_ref, w1_ref, b1_ref, w2_ref, b2_ref, *rest,
                   n_fc, hw):
    """One (ROI tile, spatial position p) grid step of the fused coarse head.

      x_ref   : (TR, 4*Cin) bf16  s2d features of spatial position p, slots (ky,kx,c)
      cls_ref : (TR, 1)     i32   predicted class per ROI (fused uncertainty)
      w1_ref  : (Cin, cd)   bf16  1x1 channel-reduce conv
      w2_ref  : (4*cd, cd)  bf16  2x2/s2 conv, rows ordered ((ky,kx), ci)
      rest    : w_fc0 (cd, fc0) slab for position p (NCHW flatten folded in), b_fc0,
                (w_i, b_i) for the remaining FCs, w_pred, b_pred,
                selm (out_pad, hw_pad) 0/1 class-chunk compaction matrix,
                o_ref (TR, out_pad) f32, unc_ref (TR, hw_pad) f32,
                acc_ref (TR, fc0) f32 VMEM scratch (carried over the p axis).
    """
    fc_refs = rest[: 2 * n_fc]
    wp_ref, bp_ref, selm_ref, o_ref, unc_ref, acc_ref = rest[2 * n_fc:]

    p = pl.program_id(1)
    cin = w1_ref.shape[0]
    cdt = x_ref.dtype

    # 1x1 channel-reduce conv (+bias+ReLU): 4 matmuls on the s2d lane slices.
    x = x_ref[...]
    w1 = w1_ref[...]
    h1 = jnp.concatenate(
        [jnp.dot(x[:, k * cin:(k + 1) * cin], w1,
                 preferred_element_type=jnp.float32) for k in range(4)],
        axis=-1)                                                  # (TR, 4*cd)
    h1 = jnp.maximum(h1 + b1_ref[...], 0.0).astype(cdt)

    # 2x2 stride-2 spatial-reduce conv (+bias+ReLU) for output position p.
    h2 = jnp.dot(h1, w2_ref[...], preferred_element_type=jnp.float32) + b2_ref[...]
    h2 = jnp.maximum(h2, 0.0).astype(cdt)                         # (TR, cd)

    # FC1 partial sum over the spatial axis (NCHW flatten folded into the weight).
    @pl.when(p == 0)
    def _():
        acc_ref[...] = jnp.zeros_like(acc_ref)

    acc_ref[...] += jnp.dot(h2, fc_refs[0][...],
                            preferred_element_type=jnp.float32)

    # Epilogue at the last spatial position: FC stack, prediction, uncertainty.
    @pl.when(p == pl.num_programs(1) - 1)
    def _():
        y = jnp.maximum(acc_ref[...] + fc_refs[1][...], 0.0).astype(cdt)
        for i in range(1, n_fc):
            w_ref, b_ref = fc_refs[2 * i], fc_refs[2 * i + 1]
            y = jnp.dot(y, w_ref[...], preferred_element_type=jnp.float32) + b_ref[...]
            y = jnp.maximum(y, 0.0).astype(cdt)
        o = jnp.dot(y, wp_ref[...], preferred_element_type=jnp.float32) + bp_ref[...]
        o_ref[...] = o

        # Fused calculate_uncertainty: -|logit of the predicted class|.
        cls = cls_ref[...]                                        # (TR, 1) int32
        lane = jax.lax.broadcasted_iota(jnp.int32, o.shape, 1)
        lo = cls * hw
        masked = jnp.where((lane >= lo) & (lane < lo + hw), o, 0.0)
        sel = jnp.dot(masked, selm_ref[...], preferred_element_type=jnp.float32)
        unc_ref[...] = -jnp.abs(sel)


# -----------------------------------------------------------------------------
# Standalone calculate_uncertainty (tiled over ROIs, lane-dense output)
# -----------------------------------------------------------------------------
def _uncertainty_kernel(logits_ref, cls_ref, o_ref):
    x = logits_ref[...]                                           # (rt, C, HWp) f32
    k = jax.lax.broadcasted_iota(jnp.int32, x.shape, 1)
    sel = jnp.sum(jnp.where(k == cls_ref[...], x, 0.0), axis=1)   # (rt, HWp)
    o_ref[...] = -jnp.abs(sel)


def calculate_uncertainty(logits, classes):
    """Pallas calculate_uncertainty: (R, C, H, W), (R,) -> (R, 1, H, W) = -|logit[cls]|."""
    R, C, H, W = logits.shape
    HW = H * W
    HWp = _round_up(HW, 128)
    r_tile = min(64, _round_up(max(R, 1), 8))
    Rp = _round_up(max(R, 1), r_tile)
    x = jnp.pad(logits.reshape(R, C, HW), ((0, Rp - R), (0, 0), (0, HWp - HW)))
    cls = jnp.clip(classes.astype(jnp.int32), 0, C - 1).reshape(R, 1, 1)
    cls = jnp.pad(cls, ((0, Rp - R), (0, 0), (0, 0)))
    out = pl.pallas_call(
        _uncertainty_kernel,
        out_shape=jax.ShapeDtypeStruct((Rp, HWp), logits.dtype),
        grid=(Rp // r_tile,),
        in_specs=[pl.BlockSpec((r_tile, C, HWp), lambda i: (i, 0, 0)),
                  pl.BlockSpec((r_tile, 1, 1), lambda i: (i, 0, 0))],
        out_specs=pl.BlockSpec((r_tile, HWp), lambda i: (i, 0)),
        compiler_params=pltpu.CompilerParams(dimension_semantics=("parallel",)),
    )(x, cls)
    return out[:R, :HW].reshape(R, 1, H, W)


# -----------------------------------------------------------------------------
# PointRendMaskHead (inference forward)
# -----------------------------------------------------------------------------
class PointRendMaskHeadPallas:
    def __init__(self, key, *, in_channels, pooler_size, conv_dim, fc_dims,
                 num_classes, out_res, feature_stride):
        assert in_channels > conv_dim, "reduce_channel_dim_conv path must be active"
        assert pooler_size % 2 == 0 and len(fc_dims) > 0
        self.pooler_size = pooler_size
        self.conv_dim = conv_dim
        self.num_classes = num_classes
        self.out_res = out_res
        self.output_shape = (num_classes, out_res, out_res)
        self.feature_scale = 1.0 / feature_stride
        self.n_fc = len(fc_dims)
        S = pooler_size
        P = (S // 2) * (S // 2)
        HW = out_res * out_res
        self.hw = HW

        ks = jax.random.split(key, 3 + self.n_fc)
        # --- raw f32 parameters (same logical layout / init scheme as the torch module)
        w1 = jax.random.normal(ks[0], (in_channels, conv_dim), jnp.float32) * (2.0 / in_channels) ** 0.5
        b1 = jnp.zeros((conv_dim,), jnp.float32)
        w2 = (jax.random.normal(ks[1], (2, 2, conv_dim, conv_dim), jnp.float32)   # (ky,kx,ci,co)
              * (2.0 / (4 * conv_dim)) ** 0.5)
        b2 = jnp.zeros((conv_dim,), jnp.float32)
        in_dim = conv_dim * P                                   # NCHW flatten index = c*P + p
        fc_ws, fc_bs = [], []
        for i, fd in enumerate(fc_dims):
            fc_ws.append(jax.random.normal(ks[2 + i], (in_dim, fd), jnp.float32)
                         * (1.0 / in_dim) ** 0.5)
            fc_bs.append(jnp.zeros((fd,), jnp.float32))
            in_dim = fd
        out_dim = num_classes * HW
        wp = jax.random.normal(ks[2 + self.n_fc], (fc_dims[-1], out_dim), jnp.float32) * 0.001
        bp = jnp.zeros((out_dim,), jnp.float32)
        self._raw = dict(w1=w1, b1=b1, w2=w2, b2=b2,
                         fcs=list(zip(fc_ws, fc_bs)), wp=wp, bp=bp)

        # --- packed parameters consumed by the fused Pallas kernel (bf16 matmul operands)
        mmdt = jnp.bfloat16
        self.w1_m = w1.astype(mmdt)                               # (Cin, cd)
        self.b1_t = jnp.tile(b1, 4).reshape(1, 4 * conv_dim)      # one bias per s2d slot
        self.w2_m = w2.reshape(4 * conv_dim, conv_dim).astype(mmdt)   # rows ((ky,kx), ci)
        self.b2_r = b2.reshape(1, conv_dim)
        # FC1 with the NCHW flatten permutation folded in: (P, cd, fc0).
        self.w_fc = [fc_ws[0].reshape(conv_dim, P, fc_dims[0]).transpose(1, 0, 2).astype(mmdt)]
        self.b_fc = [fc_bs[0].reshape(1, fc_dims[0])]
        for w, b in zip(fc_ws[1:], fc_bs[1:]):
            self.w_fc.append(w.astype(mmdt))
            self.b_fc.append(b.reshape(1, -1))
        # Prediction, N padded to a lane-dense multiple of 128.
        self.out_dim = out_dim
        self.out_pad = _round_up(out_dim, 128)
        self.hw_pad = _round_up(HW, 128)
        self.w_pred = jnp.pad(wp, ((0, 0), (0, self.out_pad - out_dim))).astype(mmdt)
        self.b_pred = jnp.pad(bp, (0, self.out_pad - out_dim)).reshape(1, self.out_pad)
        # 0/1 matrix compacting the selected class chunk to lanes [0, HW) (fused uncertainty).
        rows = (jnp.arange(num_classes)[:, None] * HW + jnp.arange(HW)[None, :]).reshape(-1)
        cols = jnp.tile(jnp.arange(HW), num_classes)
        self.sel_mat = jnp.zeros((self.out_pad, self.hw_pad), jnp.float32).at[rows, cols].set(1.0)

    # ---- ConvFCHead forward: ONE fused Pallas kernel, grid = (ROI tiles, P) ----
    def coarse_head(self, x_s2d, classes):
        """x_s2d: (P, R, 4*Cin) bf16 space-to-depth pooled ROI features.

        Returns (coarse_mask (R, K, out, out) f32, uncertainty (R, 1, out, out) f32).
        """
        P, R, C4 = x_s2d.shape
        cd, fc0 = self.conv_dim, self.w_fc[0].shape[-1]

        # ROI tiling: 8-row aligned, <= 128 rows per tile, and at least 2 tiles so
        # the "parallel" grid axis can shard across v7x's two TensorCores.
        r_tile = min(128, _round_up(-(-max(R, 1) // 2), 8))
        R_pad = _round_up(max(R, 1), r_tile)
        if R_pad // r_tile < 2:
            R_pad = 2 * r_tile
        n_tiles = R_pad // r_tile

        x = jnp.pad(x_s2d, ((0, 0), (0, R_pad - R), (0, 0)))
        cls = jnp.clip(classes.astype(jnp.int32), 0, self.num_classes - 1).reshape(R, 1)
        cls = jnp.pad(cls, ((0, R_pad - R), (0, 0)))

        in_specs = [
            pl.BlockSpec((None, r_tile, C4), lambda i, p: (p, i, 0)),      # x (per p, per tile)
            pl.BlockSpec((r_tile, 1), lambda i, p: (i, 0)),                # class ids (per tile)
            _const_spec(self.w1_m.shape), _const_spec(self.b1_t.shape),
            _const_spec(self.w2_m.shape), _const_spec(self.b2_r.shape),
            pl.BlockSpec((None, cd, fc0), lambda i, p: (p, 0, 0)),         # FC1 slab (per p)
            _const_spec(self.b_fc[0].shape),
        ]
        args = [x, cls, self.w1_m, self.b1_t, self.w2_m, self.b2_r,
                self.w_fc[0], self.b_fc[0]]
        for w, b in zip(self.w_fc[1:], self.b_fc[1:]):
            in_specs += [_const_spec(w.shape), _const_spec(b.shape)]
            args += [w, b]
        in_specs += [_const_spec(self.w_pred.shape), _const_spec(self.b_pred.shape),
                     _const_spec(self.sel_mat.shape)]
        args += [self.w_pred, self.b_pred, self.sel_mat]

        logits, unc = pl.pallas_call(
            functools.partial(_convfc_kernel, n_fc=self.n_fc, hw=self.hw),
            out_shape=(jax.ShapeDtypeStruct((R_pad, self.out_pad), jnp.float32),
                       jax.ShapeDtypeStruct((R_pad, self.hw_pad), jnp.float32)),
            grid=(n_tiles, P),
            in_specs=in_specs,
            out_specs=(pl.BlockSpec((r_tile, self.out_pad), lambda i, p: (i, 0)),
                       pl.BlockSpec((r_tile, self.hw_pad), lambda i, p: (i, 0))),
            scratch_shapes=[pltpu.VMEM((r_tile, fc0), jnp.float32)],
            compiler_params=pltpu.CompilerParams(
                dimension_semantics=("parallel", "arbitrary"),
                vmem_limit_bytes=64 * 1024 * 1024),
        )(*args)

        coarse = logits[:R, :self.out_dim].reshape((R,) + self.output_shape)
        uncertainty = unc[:R, :self.hw].reshape(R, 1, self.out_res, self.out_res)
        return coarse, uncertainty

    # ---- ROI point pooler: bilinear gather directly in s2d layout (no transpose) ----
    def _roi_pooler_s2d(self, feature, boxes):
        """feature: (B, C, H, W) NCHW p2 feature; boxes: list of (Ri, 4) xyxy.

        Returns (P, R, 4*C) bf16, slot order (ky, kx, c), p = hh*(S/2)+ww,
        matching the fused kernel's FC1 fold and w2 layout.
        """
        B, C, H, W = feature.shape
        S = self.pooler_size
        Sh = S // 2
        P = Sh * Sh
        counts = [int(b.shape[0]) for b in boxes]
        cat_boxes = jnp.concatenate(boxes, axis=0)
        img_ids = jnp.concatenate(
            [jnp.full((n,), i, jnp.int32) for i, n in enumerate(counts)])

        # Regular-grid point coords (x=(w_idx+0.5)/S, y=(h_idx+0.5)/S), laid out
        # (hh, ww, ky, kx) so the gather lands directly in s2d order.
        HH, WW, KY, KX = jnp.meshgrid(jnp.arange(Sh), jnp.arange(Sh),
                                      jnp.arange(2), jnp.arange(2), indexing="ij")
        px = (((2 * WW + KX).astype(jnp.float32) + 0.5) / S).reshape(P, 1, 4)
        py = (((2 * HH + KY).astype(jnp.float32) + 0.5) / S).reshape(P, 1, 4)

        # Box-relative -> image coords (get_point_coords_wrt_image) -> normalized
        # wrt the feature extent (point_sample_fine_grained_features).
        x0 = cat_boxes[:, 0][None, :, None]; y0 = cat_boxes[:, 1][None, :, None]
        x1 = cat_boxes[:, 2][None, :, None]; y1 = cat_boxes[:, 3][None, :, None]
        gx = (px * (x1 - x0) + x0) / (W / self.feature_scale)
        gy = (py * (y1 - y0) + y0) / (H / self.feature_scale)
        # F.grid_sample(align_corners=False, padding_mode='zeros') pixel coords.
        fx = gx * W - 0.5
        fy = gy * H - 0.5
        fx0 = jnp.floor(fx); fy0 = jnp.floor(fy)
        wx1 = fx - fx0; wy1 = fy - fy0
        wx0 = 1.0 - wx1; wy0 = 1.0 - wy1

        feature_cl = jnp.transpose(feature, (0, 2, 3, 1))         # (B, H, W, C)
        ids = img_ids[None, :, None]                              # (1, R, 1)

        def gather(yf, xf):
            valid = (xf >= 0) & (xf <= W - 1) & (yf >= 0) & (yf <= H - 1)
            xi = jnp.clip(xf, 0, W - 1).astype(jnp.int32)
            yi = jnp.clip(yf, 0, H - 1).astype(jnp.int32)
            vals = feature_cl[ids, yi, xi]                        # (P, R, 4, C)
            return vals * valid.astype(feature_cl.dtype)[..., None]

        out = (gather(fy0, fx0) * (wy0 * wx0)[..., None]
               + gather(fy0, fx0 + 1.0) * (wy0 * wx1)[..., None]
               + gather(fy0 + 1.0, fx0) * (wy1 * wx0)[..., None]
               + gather(fy0 + 1.0, fx0 + 1.0) * (wy1 * wx1)[..., None])
        return out.astype(jnp.bfloat16).reshape(P, -1, 4 * C)

    # ---- PointRendMaskHead inference forward ----
    def forward(self, features, pred_boxes, pred_classes):
        feature = features["p2"]
        x_s2d = self._roi_pooler_s2d(feature, pred_boxes)          # (P, R, 4*Cin) bf16
        coarse_mask, uncertainty = self.coarse_head(x_s2d, pred_classes)
        # TODO(synk): build_point_head / subdivision refinement source not provided;
        # return coarse mask logits plus the uncertainty map the first refinement
        # step would consume.
        return coarse_mask, uncertainty


# -----------------------------------------------------------------------------
# Pure-JAX f32 reference of ConvFCHead (for correctness checking only)
# -----------------------------------------------------------------------------
def _reference_head_f32(head, x_s2d):
    P, R, C4 = x_s2d.shape
    S = head.pooler_size
    Sh = S // 2
    Cin = C4 // 4
    raw = head._raw
    x = x_s2d.astype(jnp.float32).reshape(Sh, Sh, R, 2, 2, Cin)
    X = jnp.transpose(x, (2, 5, 0, 3, 1, 4)).reshape(R, Cin, S, S)    # (R, Cin, S, S)
    h = jax.nn.relu(jnp.einsum('rchw,cd->rdhw', X, raw['w1'])
                    + raw['b1'][None, :, None, None])
    h = h.reshape(R, head.conv_dim, Sh, 2, Sh, 2)
    h = jax.nn.relu(jnp.einsum('rchkwl,klcd->rdhw', h, raw['w2'])
                    + raw['b2'][None, :, None, None])
    z = h.reshape(R, -1)                                              # NCHW flatten
    for w, b in raw['fcs']:
        z = jax.nn.relu(z @ w + b)
    o = z @ raw['wp'] + raw['bp']
    return o.reshape((R,) + head.output_shape)


# -----------------------------------------------------------------------------
if __name__ == "__main__":
    key = jax.random.PRNGKey(0)
    k_feat, k_cls, k_par = jax.random.split(key, 3)

    # image-level feature "p2": (B=1, C=16, 32, 32), stride 4 -> image 128x128
    B, C, Hf, Wf, stride = 1, 16, 32, 32, 4
    feature = jax.random.normal(k_feat, (B, C, Hf, Wf), jnp.float32)

    num_classes = 3
    boxes = jnp.array([[4.0, 8.0, 60.0, 70.0],
                       [30.0, 20.0, 100.0, 90.0],
                       [10.0, 50.0, 80.0, 120.0]], jnp.float32)
    pred_boxes = [boxes]
    pred_classes = jax.random.randint(k_cls, (3,), 0, num_classes, jnp.int32)

    head = PointRendMaskHeadPallas(
        k_par,
        in_channels=C,          # sum of channels over ROI_MASK_HEAD.IN_FEATURES
        pooler_size=8,          # POOLER_RESOLUTION
        conv_dim=8,             # CONV_DIM (< in_channels -> channel-reduce conv on)
        fc_dims=[32, 32],       # FC_DIM x NUM_FC
        num_classes=num_classes,
        out_res=7,              # OUTPUT_SIDE_RESOLUTION
        feature_stride=stride,
    )

    fwd = jax.jit(lambda feat, bxs, cls: head.forward({"p2": feat}, bxs, cls))
    coarse_mask, uncertainty = fwd(feature, pred_boxes, pred_classes)
    jax.block_until_ready((coarse_mask, uncertainty))

    assert coarse_mask.shape == (3, num_classes, 7, 7)
    assert uncertainty.shape == (3, 1, 7, 7)
    assert bool(jnp.all(jnp.isfinite(coarse_mask)))
    assert bool(jnp.all(uncertainty <= 0.0))

    # Fused Pallas head vs a pure-JAX f32 reference of ConvFCHead (bf16 matmul tolerance).
    x_s2d = head._roi_pooler_s2d(feature, pred_boxes)
    ref_mask = _reference_head_f32(head, x_s2d)
    assert bool(jnp.allclose(coarse_mask, ref_mask, atol=3e-3, rtol=0.0)), (
        "max |diff| = %g" % float(jnp.max(jnp.abs(coarse_mask - ref_mask))))

    # Fused uncertainty epilogue vs the standalone Pallas calculate_uncertainty.
    unc_standalone = calculate_uncertainty(coarse_mask, pred_classes)
    assert bool(jnp.allclose(uncertainty, unc_standalone, atol=1e-5)), (
        "max |diff| = %g" % float(jnp.max(jnp.abs(uncertainty - unc_standalone))))

    print("KERNEL_OK")
</pallas_src>

<mosaic_0001>
module attributes {stable_mosaic.version = 11 : i64} {
  func.func @_convfc_kernel(%arg0: i32, %arg1: i32, %arg2: memref<1x8x64xbf16, #tpu.memory_space<vmem>>, %arg3: memref<8x1xi32, #tpu.memory_space<vmem>>, %arg4: memref<16x8xbf16, #tpu.memory_space<vmem>>, %arg5: memref<1x32xf32, #tpu.memory_space<vmem>>, %arg6: memref<32x8xbf16, #tpu.memory_space<vmem>>, %arg7: memref<1x8xf32, #tpu.memory_space<vmem>>, %arg8: memref<1x8x32xbf16, #tpu.memory_space<vmem>>, %arg9: memref<1x32xf32, #tpu.memory_space<vmem>>, %arg10: memref<32x32xbf16, #tpu.memory_space<vmem>>, %arg11: memref<1x32xf32, #tpu.memory_space<vmem>>, %arg12: memref<32x256xbf16, #tpu.memory_space<vmem>>, %arg13: memref<1x256xf32, #tpu.memory_space<vmem>>, %arg14: memref<256x128xf32, #tpu.memory_space<vmem>>, %arg15: memref<8x256xf32, #tpu.memory_space<vmem>>, %arg16: memref<8x128xf32, #tpu.memory_space<vmem>>, %arg17: memref<8x32xf32, #tpu.memory_space<vmem>>) attributes {dimension_semantics = [#tpu.dimension_semantics<parallel>, #tpu.dimension_semantics<arbitrary>], iteration_bounds = array<i64: 2, 16>, scalar_prefetch = 0 : i64, scratch_operands = 1 : i64, tpu.core_type = #tpu.core_type<tc>, window_params = [{transform_indices = @transform_0, window_bounds = array<i64: 1, 8, 64>}, {transform_indices = @transform_1, window_bounds = array<i64: 8, 1>}, {pipeline_mode = #tpu.pipeline_mode<synchronous>, transform_indices = @transform_2, window_bounds = array<i64: 16, 8>}, {pipeline_mode = #tpu.pipeline_mode<synchronous>, transform_indices = @transform_3, window_bounds = array<i64: 1, 32>}, {pipeline_mode = #tpu.pipeline_mode<synchronous>, transform_indices = @transform_4, window_bounds = array<i64: 32, 8>}, {pipeline_mode = #tpu.pipeline_mode<synchronous>, transform_indices = @transform_5, window_bounds = array<i64: 1, 8>}, {transform_indices = @transform_6, window_bounds = array<i64: 1, 8, 32>}, {pipeline_mode = #tpu.pipeline_mode<synchronous>, transform_indices = @transform_7, window_bounds = array<i64: 1, 32>}, {pipeline_mode = #tpu.pipeline_mode<synchronous>, transform_indices = @transform_8, window_bounds = array<i64: 32, 32>}, {pipeline_mode = #tpu.pipeline_mode<synchronous>, transform_indices = @transform_9, window_bounds = array<i64: 1, 32>}, {pipeline_mode = #tpu.pipeline_mode<synchronous>, transform_indices = @transform_10, window_bounds = array<i64: 32, 256>}, {pipeline_mode = #tpu.pipeline_mode<synchronous>, transform_indices = @transform_11, window_bounds = array<i64: 1, 256>}, {pipeline_mode = #tpu.pipeline_mode<synchronous>, transform_indices = @transform_12, window_bounds = array<i64: 256, 128>}, {transform_indices = @transform_13, window_bounds = array<i64: 8, 256>}, {transform_indices = @transform_14, window_bounds = array<i64: 8, 128>}]} {
    %c0 = arith.constant 0 : index
    %c0_0 = arith.constant 0 : index
    %c0_1 = arith.constant 0 : index
    %0 = vector.load %arg2[%c0, %c0_0, %c0_1] : memref<1x8x64xbf16, #tpu.memory_space<vmem>>, vector<1x8x64xbf16>
    %1 = vector.shape_cast %0 : vector<1x8x64xbf16> to vector<8x64xbf16>
    %c0_2 = arith.constant 0 : index
    %c0_3 = arith.constant 0 : index
    %2 = vector.load %arg4[%c0_2, %c0_3] : memref<16x8xbf16, #tpu.memory_space<vmem>>, vector<16x8xbf16>
    %3 = vector.extract_strided_slice %1 {offsets = [0, 0], sizes = [8, 16], strides = [1, 1]} : vector<8x64xbf16> to vector<8x16xbf16>
    %cst = arith.constant dense<0.000000e+00> : vector<8x8xf32>
    %4 = tpu.matmul %3, %2, %cst {dimension_numbers = #tpu.dot_dimension_numbers<[1], [0], [0], [1], [0, 0, 1, 1], [], []>} : vector<8x16xbf16>, vector<16x8xbf16>, vector<8x8xf32> -> vector<8x8xf32>
    %5 = vector.extract_strided_slice %1 {offsets = [0, 16], sizes = [8, 16], strides = [1, 1]} : vector<8x64xbf16> to vector<8x16xbf16>
    %cst_4 = arith.constant dense<0.000000e+00> : vector<8x8xf32>
    %6 = tpu.matmul %5, %2, %cst_4 {dimension_numbers = #tpu.dot_dimension_numbers<[1], [0], [0], [1], [0, 0, 1, 1], [], []>} : vector<8x16xbf16>, vector<16x8xbf16>, vector<8x8xf32> -> vector<8x8xf32>
    %7 = vector.extract_strided_slice %1 {offsets = [0, 32], sizes = [8, 16], strides = [1, 1]} : vector<8x64xbf16> to vector<8x16xbf16>
    %cst_5 = arith.constant dense<0.000000e+00> : vector<8x8xf32>
    %8 = tpu.matmul %7, %2, %cst_5 {dimension_numbers = #tpu.dot_dimension_numbers<[1], [0], [0], [1], [0, 0, 1, 1], [], []>} : vector<8x16xbf16>, vector<16x8xbf16>, vector<8x8xf32> -> vector<8x8xf32>
    %9 = vector.extract_strided_slice %1 {offsets = [0, 48], sizes = [8, 16], strides = [1, 1]} : vector<8x64xbf16> to vector<8x16xbf16>
    %cst_6 = arith.constant dense<0.000000e+00> : vector<8x8xf32>
    %10 = tpu.matmul %9, %2, %cst_6 {dimension_numbers = #tpu.dot_dimension_numbers<[1], [0], [0], [1], [0, 0, 1, 1], [], []>} : vector<8x16xbf16>, vector<16x8xbf16>, vector<8x8xf32> -> vector<8x8xf32>
    %11 = tpu.concatenate %4, %6, %8, %10 in 1 : vector<8x8xf32>, vector<8x8xf32>, vector<8x8xf32>, vector<8x8xf32> -> vector<8x32xf32>
    %c0_7 = arith.constant 0 : index
    %c0_8 = arith.constant 0 : index
    %12 = vector.load %arg5[%c0_7, %c0_8] : memref<1x32xf32, #tpu.memory_space<vmem>>, vector<1x32xf32>
    %13 = vector.broadcast %12 : vector<1x32xf32> to vector<8x32xf32>
    %14 = arith.addf %11, %13 : vector<8x32xf32>
    %cst_9 = arith.constant 0.000000e+00 : f32
    %15 = vector.broadcast %cst_9 : f32 to vector<8x32xf32>
    %16 = arith.maximumf %14, %15 : vector<8x32xf32>
    %17 = arith.truncf %16 : vector<8x32xf32> to vector<8x32xbf16>
    %c0_10 = arith.constant 0 : index
    %c0_11 = arith.constant 0 : index
    %18 = vector.load %arg6[%c0_10, %c0_11] : memref<32x8xbf16, #tpu.memory_space<vmem>>, vector<32x8xbf16>
    %cst_12 = arith.constant dense<0.000000e+00> : vector<8x8xf32>
    %19 = tpu.matmul %17, %18, %cst_12 {dimension_numbers = #tpu.dot_dimension_numbers<[1], [0], [0], [1], [0, 0, 1, 1], [], []>} : vector<8x32xbf16>, vector<32x8xbf16>, vector<8x8xf32> -> vector<8x8xf32>
    %c0_13 = arith.constant 0 : index
    %c0_14 = arith.constant 0 : index
    %20 = vector.load %arg7[%c0_13, %c0_14] : memref<1x8xf32, #tpu.memory_space<vmem>>, vector<1x8xf32>
    %21 = vector.broadcast %20 : vector<1x8xf32> to vector<8x8xf32>
    %22 = arith.addf %19, %21 : vector<8x8xf32>
    %cst_15 = arith.constant 0.000000e+00 : f32
    %23 = vector.broadcast %cst_15 : f32 to vector<8x8xf32>
    %24 = arith.maximumf %22, %23 : vector<8x8xf32>
    %25 = arith.truncf %24 : vector<8x8xf32> to vector<8x8xbf16>
    %c0_i32 = arith.constant 0 : i32
    %26 = arith.cmpi eq, %arg1, %c0_i32 : i32
    %27 = arith.extui %26 : i1 to i32
    %c0_i32_16 = arith.constant 0 : i32
    %28 = arith.cmpi ne, %27, %c0_i32_16 : i32
    scf.if %28 {
      %cst_26 = arith.constant 0.000000e+00 : f32
      %38 = vector.broadcast %cst_26 : f32 to vector<8x32xf32>
      %c0_27 = arith.constant 0 : index
      %c0_28 = arith.constant 0 : index
      %39 = vector.load %arg17[%c0_27, %c0_28] : memref<8x32xf32, #tpu.memory_space<vmem>>, vector<8x32xf32>
      tpu.vector_store %arg17[%c0_27, %c0_28], %38 {strides = array<i32>} : memref<8x32xf32, #tpu.memory_space<vmem>>, vector<8x32xf32>,
    } else {
    }
    %c0_17 = arith.constant 0 : index
    %c0_18 = arith.constant 0 : index
    %29 = vector.load %arg17[%c0_17, %c0_18] : memref<8x32xf32, #tpu.memory_space<vmem>>, vector<8x32xf32>
    %c0_19 = arith.constant 0 : index
    %c0_20 = arith.constant 0 : index
    %c0_21 = arith.constant 0 : index
    %30 = vector.load %arg8[%c0_19, %c0_20, %c0_21] : memref<1x8x32xbf16, #tpu.memory_space<vmem>>, vector<1x8x32xbf16>
    %31 = vector.shape_cast %30 : vector<1x8x32xbf16> to vector<8x32xbf16>
    %cst_22 = arith.constant dense<0.000000e+00> : vector<8x32xf32>
    %32 = tpu.matmul %25, %31, %cst_22 {dimension_numbers = #tpu.dot_dimension_numbers<[1], [0], [0], [1], [0, 0, 1, 1], [], []>} : vector<8x8xbf16>, vector<8x32xbf16>, vector<8x32xf32> -> vector<8x32xf32>
    %33 = arith.addf %29, %32 : vector<8x32xf32>
    %c0_23 = arith.constant 0 : index
    %c0_24 = arith.constant 0 : index
    %34 = vector.load %arg17[%c0_23, %c0_24] : memref<8x32xf32, #tpu.memory_space<vmem>>, vector<8x32xf32>
    tpu.vector_store %arg17[%c0_23, %c0_24], %33 {strides = array<i32>} : memref<8x32xf32, #tpu.memory_space<vmem>>, vector<8x32xf32>,
    %c15_i32 = arith.constant 15 : i32
    %35 = arith.cmpi eq, %arg1, %c15_i32 : i32
    %36 = arith.extui %35 : i1 to i32
    %c0_i32_25 = arith.constant 0 : i32
    %37 = arith.cmpi ne, %36, %c0_i32_25 : i32
    scf.if %37 {
      %c0_26 = arith.constant 0 : index
      %c0_27 = arith.constant 0 : index
      %38 = vector.load %arg17[%c0_26, %c0_27] : memref<8x32xf32, #tpu.memory_space<vmem>>, vector<8x32xf32>
      %c0_28 = arith.constant 0 : index
      %c0_29 = arith.constant 0 : index
      %39 = vector.load %arg9[%c0_28, %c0_29] : memref<1x32xf32, #tpu.memory_space<vmem>>, vector<1x32xf32>
      %40 = vector.broadcast %39 : vector<1x32xf32> to vector<8x32xf32>
      %41 = arith.addf %38, %40 : vector<8x32xf32>
      %cst_30 = arith.constant 0.000000e+00 : f32
      %42 = vector.broadcast %cst_30 : f32 to vector<8x32xf32>
      %43 = arith.maximumf %41, %42 : vector<8x32xf32>
      %44 = arith.truncf %43 : vector<8x32xf32> to vector<8x32xbf16>
      %c0_31 = arith.constant 0 : index
      %c0_32 = arith.constant 0 : index
      %45 = vector.load %arg10[%c0_31, %c0_32] : memref<32x32xbf16, #tpu.memory_space<vmem>>, vector<32x32xbf16>
      %cst_33 = arith.constant dense<0.000000e+00> : vector<8x32xf32>
      %46 = tpu.matmul %44, %45, %cst_33 {dimension_numbers = #tpu.dot_dimension_numbers<[1], [0], [0], [1], [0, 0, 1, 1], [], []>} : vector<8x32xbf16>, vector<32x32xbf16>, vector<8x32xf32> -> vector<8x32xf32>
      %c0_34 = arith.constant 0 : index
      %c0_35 = arith.constant 0 : index
      %47 = vector.load %arg11[%c0_34, %c0_35] : memref<1x32xf32, #tpu.memory_space<vmem>>, vector<1x32xf32>
      %48 = vector.broadcast %47 : vector<1x32xf32> to vector<8x32xf32>
      %49 = arith.addf %46, %48 : vector<8x32xf32>
      %cst_36 = arith.constant 0.000000e+00 : f32
      %50 = vector.broadcast %cst_36 : f32 to vector<8x32xf32>
      %51 = arith.maximumf %49, %50 : vector<8x32xf32>
      %52 = arith.truncf %51 : vector<8x32xf32> to vector<8x32xbf16>
      %c0_37 = arith.constant 0 : index
      %c0_38 = arith.constant 0 : index
      %53 = vector.load %arg12[%c0_37, %c0_38] : memref<32x256xbf16, #tpu.memory_space<vmem>>, vector<32x256xbf16>
      %cst_39 = arith.constant dense<0.000000e+00> : vector<8x256xf32>
      %54 = tpu.matmul %52, %53, %cst_39 {dimension_numbers = #tpu.dot_dimension_numbers<[1], [0], [0], [1], [0, 0, 1, 1], [], []>} : vector<8x32xbf16>, vector<32x256xbf16>, vector<8x256xf32> -> vector<8x256xf32>
      %c0_40 = arith.constant 0 : index
      %c0_41 = arith.constant 0 : index
      %55 = vector.load %arg13[%c0_40, %c0_41] : memref<1x256xf32, #tpu.memory_space<vmem>>, vector<1x256xf32>
      %56 = vector.broadcast %55 : vector<1x256xf32> to vector<8x256xf32>
      %57 = arith.addf %54, %56 : vector<8x256xf32>
      %c0_42 = arith.constant 0 : index
      %c0_43 = arith.constant 0 : index
      %58 = vector.load %arg15[%c0_42, %c0_43] : memref<8x256xf32, #tpu.memory_space<vmem>>, vector<8x256xf32>
      tpu.vector_store %arg15[%c0_42, %c0_43], %57 {strides = array<i32>} : memref<8x256xf32, #tpu.memory_space<vmem>>, vector<8x256xf32>,
      %c0_44 = arith.constant 0 : index
      %c0_45 = arith.constant 0 : index
      %59 = vector.load %arg3[%c0_44, %c0_45] : memref<8x1xi32, #tpu.memory_space<vmem>>, vector<8x1xi32>
      %60 = tpu.iota {dimensions = array<i32: 1>} : vector<8x256xi32>
      %c49_i32 = arith.constant 49 : i32
      %61 = vector.broadcast %c49_i32 : i32 to vector<8x1xi32>
      %62 = arith.muli %59, %61 : vector<8x1xi32>
      %63 = vector.broadcast %62 : vector<8x1xi32> to vector<8x256xi32>
      %64 = arith.cmpi sge, %60, %63 : vector<8x256xi32>
      %c49_i32_46 = arith.constant 49 : i32
      %65 = vector.broadcast %c49_i32_46 : i32 to vector<8x1xi32>
      %66 = arith.addi %62, %65 : vector<8x1xi32>
      %67 = vector.broadcast %66 : vector<8x1xi32> to vector<8x256xi32>
      %68 = arith.cmpi slt, %60, %67 : vector<8x256xi32>
      %69 = arith.andi %64, %68 : vector<8x256xi1>
      %cst_47 = arith.constant 0.000000e+00 : f32
      %70 = vector.broadcast %cst_47 : f32 to vector<8x256xf32>
      %71 = arith.select %69, %57, %70 : vector<8x256xi1>, vector<8x256xf32>
      %c0_48 = arith.constant 0 : index
      %c0_49 = arith.constant 0 : index
      %72 = vector.load %arg14[%c0_48, %c0_49] : memref<256x128xf32, #tpu.memory_space<vmem>>, vector<256x128xf32>
      %cst_50 = arith.constant dense<0.000000e+00> : vector<8x128xf32>
      %73 = tpu.matmul %71, %72, %cst_50 {dimension_numbers = #tpu.dot_dimension_numbers<[1], [0], [0], [1], [0, 0, 1, 1], [], []>} : vector<8x256xf32>, vector<256x128xf32>, vector<8x128xf32> -> vector<8x128xf32>
      %74 = math.absf %73 : vector<8x128xf32>
      %cst_51 = arith.constant 0.000000e+00 : f32
      %75 = vector.broadcast %cst_51 : f32 to vector<8x128xf32>
      %76 = arith.subf %75, %74 : vector<8x128xf32>
      %c0_52 = arith.constant 0 : index
      %c0_53 = arith.constant 0 : index
      %77 = vector.load %arg16[%c0_52, %c0_53] : memref<8x128xf32, #tpu.memory_space<vmem>>, vector<8x128xf32>
      tpu.vector_store %arg16[%c0_52, %c0_53], %76 {strides = array<i32>} : memref<8x128xf32, #tpu.memory_space<vmem>>, vector<8x128xf32>,
    } else {
    }
    return
  }
  func.func @transform_0(%arg0: i32, %arg1: i32) -> (i32, i32, i32) {
    %c0_i32 = arith.constant 0 : i32
    %c0_i32_0 = arith.constant 0 : i32
    return %arg1, %arg0, %c0_i32 : i32, i32, i32
  }
  func.func @transform_1(%arg0: i32, %arg1: i32) -> (i32, i32) {
    %c0_i32 = arith.constant 0 : i32
    %c0_i32_0 = arith.constant 0 : i32
    return %arg0, %c0_i32 : i32, i32
  }
  func.func @transform_2(%arg0: i32, %arg1: i32) -> (i32, i32) {
    %c0_i32 = arith.constant 0 : i32
    %c0_i32_0 = arith.constant 0 : i32
    %c0_i32_1 = arith.constant 0 : i32
    return %c0_i32, %c0_i32_0 : i32, i32
  }
  func.func @transform_3(%arg0: i32, %arg1: i32) -> (i32, i32) {
    %c0_i32 = arith.constant 0 : i32
    %c0_i32_0 = arith.constant 0 : i32
    %c0_i32_1 = arith.constant 0 : i32
    return %c0_i32, %c0_i32_0 : i32, i32
  }
  func.func @transform_4(%arg0: i32, %arg1: i32) -> (i32, i32) {
    %c0_i32 = arith.constant 0 : i32
    %c0_i32_0 = arith.constant 0 : i32
    %c0_i32_1 = arith.constant 0 : i32
    return %c0_i32, %c0_i32_0 : i32, i32
  }
  func.func @transform_5(%arg0: i32, %arg1: i32) -> (i32, i32) {
    %c0_i32 = arith.constant 0 : i32
    %c0_i32_0 = arith.constant 0 : i32
    %c0_i32_1 = arith.constant 0 : i32
    return %c0_i32, %c0_i32_0 : i32, i32
  }
  func.func @transform_6(%arg0: i32, %arg1: i32) -> (i32, i32, i32) {
    %c0_i32 = arith.constant 0 : i32
    %c0_i32_0 = arith.constant 0 : i32
    %c0_i32_1 = arith.constant 0 : i32
    return %arg1, %c0_i32, %c0_i32_0 : i32, i32, i32
  }
  func.func @transform_7(%arg0: i32, %arg1: i32) -> (i32, i32) {
    %c0_i32 = arith.constant 0 : i32
    %c0_i32_0 = arith.constant 0 : i32
    %c0_i32_1 = arith.constant 0 : i32
    return %c0_i32, %c0_i32_0 : i32, i32
  }
  func.func @transform_8(%arg0: i32, %arg1: i32) -> (i32, i32) {
    %c0_i32 = arith.constant 0 : i32
    %c0_i32_0 = arith.constant 0 : i32
    %c0_i32_1 = arith.constant 0 : i32
    return %c0_i32, %c0_i32_0 : i32, i32
  }
  func.func @transform_9(%arg0: i32, %arg1: i32) -> (i32, i32) {
    %c0_i32 = arith.constant 0 : i32
    %c0_i32_0 = arith.constant 0 : i32
    %c0_i32_1 = arith.constant 0 : i32
    return %c0_i32, %c0_i32_0 : i32, i32
  }
  func.func @transform_10(%arg0: i32, %arg1: i32) -> (i32, i32) {
    %c0_i32 = arith.constant 0 : i32
    %c0_i32_0 = arith.constant 0 : i32
    %c0_i32_1 = arith.constant 0 : i32
    return %c0_i32, %c0_i32_0 : i32, i32
  }
  func.func @transform_11(%arg0: i32, %arg1: i32) -> (i32, i32) {
    %c0_i32 = arith.constant 0 : i32
    %c0_i32_0 = arith.constant 0 : i32
    %c0_i32_1 = arith.constant 0 : i32
    return %c0_i32, %c0_i32_0 : i32, i32
  }
  func.func @transform_12(%arg0: i32, %arg1: i32) -> (i32, i32) {
    %c0_i32 = arith.constant 0 : i32
    %c0_i32_0 = arith.constant 0 : i32
    %c0_i32_1 = arith.constant 0 : i32
    return %c0_i32, %c0_i32_0 : i32, i32
  }
  func.func @transform_13(%arg0: i32, %arg1: i32) -> (i32, i32) {
    %c0_i32 = arith.constant 0 : i32
    %c0_i32_0 = arith.constant 0 : i32
    return %arg0, %c0_i32 : i32, i32
  }
  func.func @transform_14(%arg0: i32, %arg1: i32) -> (i32, i32) {
    %c0_i32 = arith.constant 0 : i32
    %c0_i32_0 = arith.constant 0 : i32
    return %arg0, %c0_i32 : i32, i32
  }
}

</mosaic_0001>

<bundles_post_ra>
// kernel: sub.31
= control target key start
LH: loop header
LB: loop body
LE: loop exit
PB: predicated region body
PF: predicated region fallthrough
CT: control target
= control target key end

     0   :  { %s34_s0 = inlined_call_operand.vmem [shape: f32[3], index: 0, kind: input, shape index: {}]   ;;  %s35_s1 = inlined_call_operand.vmem [shape: f32[3], index: 1, kind: input, shape index: {}]   ;;  %s36_s2 = inlined_call_operand.vmem [shape: f32[3], index: 2, kind: output, shape index: {}]  }
   0x1   :  { %v3_v0 = vld [vmem:[%s34_s0] sm:$0x1] }
   0x2   :  { %v4_v1 = vld [vmem:[%s35_s1] sm:$0x1] }
   0x3   :  { %v7_v2 = vsub.f32 %v3_v0, %v4_v1 }
   0x5   :  { %9 = vst [vmem:[%s36_s2] sm:$0x1] %v7_v2 }

// kernel: _lambda_.1
= control target key start
LH: loop header
LB: loop body
LE: loop exit
PB: predicated region body
PF: predicated region fallthrough
CT: control target
= control target key end

     0   :  { %s1627_s29 = smov 0   ;;  %s1629_s30 = smov 0   ;;  %s1875_s0 = inlined_call_operand.vmem [shape: bf16[16,16,64], index: 0, kind: input, shape index: {}]   ;;  %s1876_s1 = inlined_call_operand.vmem [shape: s32[16,1], index: 1, kind: input, shape index: {}]   ;;  %s1877_s2 = inlined_call_operand.vmem [shape: bf16[16,8], index: 2, kind: input, shape index: {}]   ;;  %s1878_s3 = inlined_call_operand.vmem [shape: f32[1,32], index: 3, kind: input, shape index: {}, may-alias: {3,7,9}]   ;;  %s1879_s4 = inlined_call_operand.vmem [shape: bf16[32,8], index: 4, kind: input, shape index: {}]   ;;  %s1880_s5 = inlined_call_operand.vmem [shape: f32[1,8], index: 5, kind: input, shape index: {}]   ;;  %s1881_s6 = inlined_call_operand.vmem [shape: bf16[16,8,32], index: 6, kind: input, shape index: {}]   ;;  %s1882_s7 = inlined_call_operand.vmem [shape: f32[1,32], index: 7, kind: input, shape index: {}, may-alias: {3,7,9}]   ;;  %s1883_s8 = inlined_call_operand.vmem [shape: bf16[32,32], index: 8, kind: input, shape index: {}]   ;;  %s1884_s9 = inlined_call_operand.vmem [shape: f32[1,32], index: 9, kind: input, shape index: {}, may-alias: {3,7,9}]   ;;  %s1885_s10 = inlined_call_operand.vmem [shape: bf16[32,256], index: 10, kind: input, shape index: {}]   ;;  %s1886_s11 = inlined_call_operand.vmem [shape: f32[1,256], index: 11, kind: input, shape index: {}]   ;;  %s1887_s12 = inlined_call_operand.vmem [shape: f32[256,128], index: 12, kind: input, shape index: {}]   ;;  %s1888_s13 = inlined_call_operand.vmem [shape: f32[16,256], index: 13, kind: output, shape index: {0}]   ;;  %s1889_s14 = inlined_call_operand.vmem [shape: f32[16,128], index: 14, kind: output, shape index: {1}]  }
   0x1   :  { %1893 = sst [smem:[#allocation8_spill]] %s1876_s1  ;;  %s1631_s15 = smov 0  }
   0x2   :  { %1894 = sst [smem:[#allocation9_spill]] %s1877_s2  ;;  %s1633_s16 = smov 0  }
   0x3   :  { %1895 = sst [smem:[#allocation10_spill]] %s1886_s11  ;;  %s1635_s17 = smov 0  }
   0x4 LB: > { %1896 = sst [smem:[#allocation3_spill]] %s1530_s15  ;;  %s34_s18 = sadd.s32 1, %s1530_s15  ;;  %s1538_s17 = sphi %s1635_s17, %s25_s17   ;;  %s1534_s16 = sphi %s1633_s16, %s1908_s16   ;;  %s1530_s15 = sphi %s1631_s15, %s1907_s15   ;;  %s1526_s30 = sphi %s1629_s30, %s1906_s30   ;;  %s1522_s29 = sphi %s1627_s29, %s1905_s29  }
   0x5   : > { %1897 = sst [smem:[#allocation4_spill]] %s1534_s16  ;;  %s37_s19 = sadd.s32 1, %s1534_s16 }
   0x6   : > { %1898 = sst [smem:[#allocation5_spill]] %s1538_s17  ;;  %p35_p0 = scmp.ge.s32.totalorder %s34_s18, 16 }
   0x7   : > { %p1301_p1 = scmp.ge.s32.totalorder %s1538_s17, 1  ;;  %p450_p2 = scmp.lt.s32.totalorder %s1538_s17, 33 }
   0x8   : > { %s1910_s18 = smov (%p35_p0, %s34_s18), 0  ;;  %s1912_s19 = smov (!%p35_p0, %s37_s19), %s1534_s16 }
   0x9   : > { %1899 = sst [smem:[#allocation6_spill]] %s1910_s18  ;;  %p451_p3 = pnand %p1301_p1, %p450_p2 }
   0xa   : > { %p39_p4 = scmp.ge.s32.totalorder %s1912_s19, 2  ;;  %p511_p5 = scmp.lt.s32.totalorder (!%p451_p3), %s1522_s29, 15 }
   0xb   : > { %454 = sbr.rel (%p451_p3) target bundleno = 1477 (0x5c5), region = 72  ;;  %p513_p6 = scmp.lt.s32.totalorder (!%p451_p3), %s1526_s30, 1 }
   0xc   : > { %s1914_s19 = smov (%p39_p4, %s1912_s19), 0  ;;  %s1901_s2 = sld [smem:[#allocation9_spill]] (!%p451_p3) }
   0xd   : > { %1900 = sst [smem:[#allocation7_spill]] %s1914_s19  ;;  %s1544_s11 = smov (!%p451_p3), 96  }
   0xe   : > { %s1902_s1 = sld [smem:[#allocation8_spill]] (!%p451_p3)  ;;  %p1320_p7 = scmp.ne.s32.totalorder (!%p451_p3), %s1522_s29, 0 }
  0x10   : > { %v1540_v1 = vmov 0.0   ;;  %s512_s22 = scalar_select %p511_p5, %s1522_s29, 15  ;;  %vm1541_vm0 = vmmov 0   ;;  %vm546_vm1 = vcmask 130048   ;;  %v1489_v11 = vld [vmem:[%s1879_s4 + $0x8] sm:$0xff]   ;;  %v1490_v12 = vld [vmem:[%s1879_s4] sm:$0xff]  }
  0x11   : > { %1389 = vmatprep.subr.bf16.mxu0 %v1540_v1  ;;  %1395 = vmatprep.subr.bf16.mxu1 %v1540_v1  ;;  %s1916_s30 = smov (!%p513_p6, %s1526_s30), 1  ;;  %vm740_vm2 = vcmask 64512   ;;  %vm743_vm3 = vcmask 195584   ;;  %v1315_v28 = vld [vmem:[%s1878_s3] ss:$0 sm:$0xff]  ;;  %vm778_vm4 = vcmask 261120  }
  0x12   : > { %v1488_v0 = vld [vmem:[%s1901_s2] sm:$0xff]   ;;  %1391 = vmatprep.mubr.msk.bf16.mxu0 %vm1541_vm0, %v1540_v1  ;;  %s1302_s23 = sshll.u32 %s512_s22, 1  ;;  %s1305_s24 = sshll.u32 %s512_s22, 2  ;;  %1397 = vmatprep.mubr.msk.bf16.mxu1 %vm1541_vm0, %v1540_v1 }
  0x13   : > { %1390 = vmatpush3.bf16.msra.mxu0 %v1488_v0  ;;  %1396 = vmatpush3.bf16.msra.mxu1 %v1488_v0  ;;  %s516_s25 = sadd.s32 %s1302_s23, %s1916_s30  ;;  %s1304_s26 = sshll.u32 %s1916_s30, 3  ;;  %v1316_v35 = vld [vmem:[%s1880_s5] ss:$0 sm:$0xff] }
  0x14   : > { %1401 = vmatprep.subr.bf16.mxu0 %v1540_v1  ;;  %1407 = vmatprep.subr.bf16.mxu1 %v1540_v1  ;;  %s1303_s27 = sshll.u32 %s516_s25, 2  ;;  %s1675_s21 = scalar_lea.vmem %s1902_s1, %s1304_s26 }
  0x15   : > { %s518_s18 = scalar_lea.vmem %s1875_s0, %s1303_s27  ;;  %s1683_s15 = scalar_lea.vmem %s1881_s6, %s1305_s24 }
  0x16   : > { %s1337_s17 = sshll.u32 %s1916_s30, 4  ;;  %s1688_s25 = scalar_lea.vmem %s1889_s14, %s1304_s26  ;;  %v537_v2 = vld [vmem:[%s518_s18] sm:$0xf] }
  0x17   : > { %s1693_s1 = scalar_lea.vmem %s1888_s13, %s1337_s17  ;;  %v1311_v3 = vcombine.low %v537_v2, %v537_v2  ;;  %1392 = vmatmul.mubr.msk.bf16.vlgmr.msra.gmra.mxu0 %vm546_vm1, %v537_v2  ;;  %s1542_s2 = smov 112  }
  0x18   : > { %1402 = vmatpush3.bf16.msra.mxu0 %v1488_v0  ;;  %1403 = vmatprep.mubr.msk.bf16.mxu0 %vm1541_vm0, %v1540_v1  ;;  %s1543_s30 = smov 80   ;;  %s1545_s24 = smov 8  }
  0x19   : > { %593 = vrot.lane.b32.xlu0 %v1311_v3, %s1542_s2  ;;  %683 = vrot.lane.b32.xlu1 %v1311_v3, %s1543_s30  ;;  %s1546_s26 = smov 16   ;;  %s1547_s27 = smov 24  }
  0x1a   : > { %1413 = vmatprep.subr.bf16.mxu0 %v1540_v1 }
  0x1d   : > { %638 = vrot.lane.b32.xlu0 %v1311_v3, %s1544_s11 }
  0x8b   : > { %v594_v4 = vpop.permute.xlu0 %593  ;;  %v684_v6 = vpop.permute.xlu1 %683 }
  0x8c   : > { %1398 = vmatmul.mubr.msk.bf16.vlgmr.msra.gmra.mxu1 %vm546_vm1, %v594_v4 }
  0x8d   : > { %1408 = vmatpush3.bf16.msra.mxu1 %v1488_v0  ;;  %1409 = vmatprep.mubr.msk.bf16.mxu1 %vm1541_vm0, %v1540_v1 }
  0x8f   : > { %v639_v5 = vpop.permute.xlu0 %638 }
  0x90   : > { %1404 = vmatmul.mubr.msk.bf16.vlgmr.msra.gmra.mxu0 %vm546_vm1, %v639_v5 }
  0x91   : > { %1417 = vmatprep.mubr.msk.bf16.mxu0 %vm1541_vm0, %v1540_v1  ;;  %1414 = vmatpush3.bf16.msra.mxu0 %v1489_v11 }
  0x92   : > { %1415 = vmatprep.subr.bf16.mxu0 %v1540_v1 }
  0x94   : > { %1410 = vmatmul.mubr.msk.bf16.vlgmr.msra.gmra.mxu1 %vm546_vm1, %v684_v6 }
  0x95   : > { %1416 = vmatpush3.bf16.msra.mxu0 %v1490_v12 }
  0xd7   : > { %v584_v7 = vpop.f32.mrf.mxu0 }
  0xd9   : > { %v1393_v8 = vpop.f32.mrf.mxu0 }
  0xdb   : > { %v587_v9 = vpop.f32.mrf.mxu0 }
  0xdd   : > { %v1394_v10 = vpop.f32.mrf.mxu0 }
 0x14c   : > { %v632_v13 = vpop.f32.mrf.mxu1 }
 0x14d   : > { %729 = vrot.lane.b32.xlu1 %v632_v13, %s1545_s24 }
 0x14e   : > { %v1399_v14 = vpop.f32.mrf.mxu1 }
 0x150   : > { %v635_v15 = vpop.f32.mrf.mxu1  ;;  %v677_v16 = vpop.f32.mrf.mxu0 }
 0x151   : > { %733 = vrot.lane.b32.xlu0 %v677_v16, %s1546_s26 }
 0x152   : > { %v1400_v17 = vpop.f32.mrf.mxu1  ;;  %v1405_v18 = vpop.f32.mrf.mxu0 }
 0x154   : > { %v680_v19 = vpop.f32.mrf.mxu0  ;;  %v722_v20 = vpop.f32.mrf.mxu1 }
 0x155   : > { %737 = vrot.lane.b32.xlu1 %v722_v20, %s1547_s27 }
 0x156   : > { %v1406_v21 = vpop.f32.mrf.mxu0  ;;  %v1411_v22 = vpop.f32.mrf.mxu1 }
 0x158   : > { %v725_v23 = vpop.f32.mrf.mxu1 }
 0x15a   : > { %v1412_v24 = vpop.f32.mrf.mxu1 }
 0x1bf   : > { %v730_v25 = vpop.permute.xlu1 %729 }
 0x1c0   : > { %v741_v27 = vsel %vm740_vm2, %v584_v7, %v730_v25 }
 0x1c3   : > { %v734_v26 = vpop.permute.xlu0 %733 }
 0x1c4   : > { %v742_v29 = vsel %vm546_vm1, %v741_v27, %v734_v26 }
 0x1c7   : > { %v738_v30 = vpop.permute.xlu1 %737 }
 0x1c8   : > { %v744_v31 = vsel %vm743_vm3, %v742_v29, %v738_v30 }
 0x1c9   : > { %v752_v32 = vadd.f32 %v1315_v28, %v744_v31 }
 0x1cb   : > { %v753_v33 = vmax.f32 %v752_v32, 0.0 }
 0x1cd   : > { %v754_v34 = vpack.c.bf16 %v753_v33, %v753_v33 }
 0x1cf   : > { %1418 = vmatmul.mubr.msk.bf16.vlgmr.msra.gmra.mxu0 %vm778_vm4, %v754_v34 }
 0x28f   : > { %v816_v36 = vpop.f32.mrf.mxu0 }
 0x290   : > { %v817_v37 = vadd.f32 %v1316_v35, %v816_v36 }
 0x291   : > { %v1419_v38 = vpop.f32.mrf.mxu0  ;;  %827 = sbr.rel (%p1320_p7) target bundleno = 664 (0x298), region = 76 }
 0x292   : > { %v822_v39 = vmax.f32 %v817_v37, 0.0 }
 0x293   : > { %v819_v40 = vpop.f32.mrf.mxu0 }
 0x294   : > { %v823_v41 = vpack.c.bf16 %v822_v39, %v822_v39 }
 0x295   : > { %v1420_v42 = vpop.f32.mrf.mxu0 }
 0x296   : > { %v1548_v43 = vmov 0.0  }
 0x297   : > { %828 = vst.msk [vmem:[#allocation2] sm:$0xff] %vm778_vm4, %v1548_v43 }
 0x298 PF: > { %1421 = vmatprep.subr.bf16.mxu1 %v1540_v1  ;;  %v830_v44 = vld [vmem:[%s1683_s15] sm:$0xf]  ;;  %vm834_vm5 = vcmask 1043456   ;;  %1423 = vmatprep.mubr.msk.bf16.mxu1 %vm1541_vm0, %v1540_v1  ;;  %p1322_p8 = scmp.ne.s32.totalorder %s1522_s29, 15 }
 0x299   : > { %v836_v45 = vsel %vm834_vm5, %v830_v44, 0  ;;  %s1903_s28 = sld [smem:[#allocation10_spill]] (!%p1322_p8) }
 0x29a   : > { %1422 = vmatpush3.bf16.msra.mxu1 %v836_v45 }
 0x29d   : > { %1424 = vmatmul.mubr.msk.bf16.vlgmr.msra.gmra.mxu1 %vm740_vm2, %v823_v41 }
 0x29e   : > { %v829_v46 = vld [vmem:[#allocation2] sm:$0xff] }
 0x35d   : > { %v872_v47 = vpop.f32.mrf.mxu1 }
 0x35e   : > { %v878_v48 = vadd.f32 %v872_v47, %v829_v46 }
 0x35f   : > { %v1425_v49 = vpop.f32.mrf.mxu1  ;;  %883 = sbr.rel (%p1322_p8) target bundleno = 1477 (0x5c5), region = 80 }
 0x360   : > { %879 = vst.msk [vmem:[#allocation2] sm:$0xff] %vm778_vm4, %v878_v48 }
 0x361   : > { %v875_v50 = vpop.f32.mrf.mxu1 }
 0x363   : > { %v1426_v51 = vpop.f32.mrf.mxu1 }
 0x364   : > { %v1492_v52 = vld [vmem:[%s1883_s8 + $0x8] sm:$0xff]   ;;  %v1549_v53 = vmov 0.0   ;;  %v1493_v54 = vld [vmem:[%s1883_s8] sm:$0xff]   ;;  %vm1550_vm6 = vmmov 0   ;;  %v1496_v58 = vld [vmem:[%s1885_s10 + $0x14] ss:$8 sps:$4 sm:$0xff]   ;;  %v969_v44 = vlaneseq }
 0x365   : > { %1427 = vmatprep.subr.bf16.mxu1 %v1549_v53  ;;  %1431 = vmatprep.mubr.msk.bf16.mxu1 %vm1550_vm6, %v1549_v53  ;;  %v1323_v56 = vld [vmem:[%s1882_s7] ss:$0 sm:$0xff]  ;;  %v1494_v60 = vld [vmem:[%s1885_s10 + $0x10] ss:$8 sps:$4 sm:$0xff]   ;;  %v1499_v62 = vld [vmem:[%s1885_s10 + $0x4] ss:$8 sps:$4 sm:$0xff]  }
 0x366   : > { %1428 = vmatpush3.bf16.msra.mxu1 %v1492_v52  ;;  %v1497_v63 = vld [vmem:[%s1885_s10] ss:$8 sps:$4 sm:$0xff]   ;;  %v1551_v0 = vmov 0   ;;  %v1096_v2 = vld [vmem:[%s1887_s12 + $0xf8] sm:$0xff]  ;;  %v1095_v5 = vld [vmem:[%s1887_s12 + $0xf0] sm:$0xff]  ;;  %v970_v45 = vshrl.u32 %v969_v44, 7 }
 0x367   : > { %v884_v55 = vld [vmem:[#allocation2] sm:$0xff]  ;;  %1429 = vmatprep.subr.bf16.mxu1 %v1549_v53  ;;  %1491 = vset.pattern.permute.xlu0 %v1551_v0  ;;  %v1080_v3 = vld [vmem:[%s1887_s12 + $0x78] sm:$0xff]  ;;  %v1079_v6 = vld [vmem:[%s1887_s12 + $0x70] sm:$0xff]  ;;  %v1047_v47 = vand.u32 127, %v969_v44 }
 0x368   : > { %v892_v57 = vadd.f32 %v1323_v56, %v884_v55  ;;  %v1045_v1 = vld [vmem:[%s1675_s21] sm:$0xff]  ;;  %1354 = vmatprep.subr.mxu0 %v1096_v2  ;;  %v1094_v7 = vld [vmem:[%s1887_s12 + $0xe8] sm:$0xff]  ;;  %v1092_v12 = vld [vmem:[%s1887_s12 + $0xd8] sm:$0xff]  ;;  %v971_v48 = vsub.s32 0, %v970_v45  ;;  %v975_v50 = vsub.s32 1, %v970_v45 }
 0x369   : > { %v1049_v4 = vmul.u32 49, %v1045_v1  ;;  %1355 = vmatpush3.msra.mxu0 %v1080_v3  ;;  %v1078_v9 = vld [vmem:[%s1887_s12 + $0x68] sm:$0xff]  ;;  %v1093_v10 = vld [vmem:[%s1887_s12 + $0xe0] sm:$0xff]  ;;  %v1076_v13 = vld [vmem:[%s1887_s12 + $0x58] sm:$0xff]  ;;  %v1048_v51 = vadd.s32 128, %v1047_v47 }
 0x36a   : > { %v893_v59 = vmax.f32 %v892_v57, 0.0  ;;  %1430 = vmatpush3.bf16.msra.mxu1 %v1493_v54  ;;  %1356 = vmatprep.subr.mxu0 %v1095_v5  ;;  %v1077_v11 = vld [vmem:[%s1887_s12 + $0x60] sm:$0xff]  ;;  %v1091_v14 = vld [vmem:[%s1887_s12 + $0xd0] sm:$0xff]  ;;  %v1090_v16 = vld [vmem:[%s1887_s12 + $0xc8] sm:$0xff] }
 0x36b   : > { %1014 = vmatprep.subr.bf16.mxu1 %v1496_v58  ;;  %v1055_v8 = vadd.s32 49, %v1049_v4  ;;  %1051 = vperm.xlu0 %1491, %v1049_v4   ;;  %v1075_v15 = vld [vmem:[%s1887_s12 + $0x50] sm:$0xff]  ;;  %v1074_v17 = vld [vmem:[%s1887_s12 + $0x48] sm:$0xff]  ;;  %v1089_v18 = vld [vmem:[%s1887_s12 + $0xc0] sm:$0xff] }
 0x36c   : > { %v894_v61 = vpack.c.bf16 %v893_v59, %v893_v59  ;;  %1357 = vmatpush3.msra.mxu0 %v1079_v6  ;;  %v1073_v19 = vld [vmem:[%s1887_s12 + $0x40] sm:$0xff]  ;;  %v1088_v20 = vld [vmem:[%s1887_s12 + $0xb8] sm:$0xff]  ;;  %v1087_v22 = vld [vmem:[%s1887_s12 + $0xb0] sm:$0xff] }
 0x36d   : > { %1358 = vmatprep.subr.mxu0 %v1094_v7  ;;  %v1072_v21 = vld [vmem:[%s1887_s12 + $0x38] sm:$0xff]  ;;  %v1071_v23 = vld [vmem:[%s1887_s12 + $0x30] sm:$0xff]  ;;  %v1086_v24 = vld [vmem:[%s1887_s12 + $0xa8] sm:$0xff] }
 0x36e   : > { %1432 = vmatmul.mubr.msk.bf16.vlgmr.msra.gmra.mxu1 %vm778_vm4, %v894_v61  ;;  %1359 = vmatpush3.msra.mxu0 %v1078_v9  ;;  %v1070_v25 = vld [vmem:[%s1887_s12 + $0x28] sm:$0xff]  ;;  %v1085_v26 = vld [vmem:[%s1887_s12 + $0xa0] sm:$0xff]  ;;  %v1084_v28 = vld [vmem:[%s1887_s12 + $0x98] sm:$0xff] }
 0x36f   : > { %1015 = vmatpush1.bf16.msra.mxu1 %v1494_v60  ;;  %1034 = vmatprep.mubr.bf16.mxu1 %v1551_v0  ;;  %v1069_v27 = vld [vmem:[%s1887_s12 + $0x20] sm:$0xff]  ;;  %v1068_v29 = vld [vmem:[%s1887_s12 + $0x18] sm:$0xff]  ;;  %v1083_v38 = vld [vmem:[%s1887_s12 + $0x90] sm:$0xff] }
 0x370   : > { %1016 = vmatprep.subr.bf16.mxu1 %v1499_v62  ;;  %1057 = vperm.xlu0 %1491, %v1055_v8   ;;  %v1324_v30 = vld [vmem:[%s1884_s9] ss:$0 sm:$0xff]  ;;  %v1067_v39 = vld [vmem:[%s1887_s12 + $0x10] sm:$0xff]  ;;  %v1082_v40 = vld [vmem:[%s1887_s12 + $0x88] sm:$0xff] }
 0x371   : > { %1360 = vmatprep.subr.mxu0 %v1093_v10  ;;  %v1066_v41 = vld [vmem:[%s1887_s12 + $0x8] sm:$0xff]  ;;  %v1081_v42 = vld [vmem:[%s1887_s12 + $0x80] sm:$0xff] }
 0x372   : > { %1361 = vmatpush3.msra.mxu0 %v1077_v11  ;;  %v1065_v43 = vld [vmem:[%s1887_s12] sm:$0xff] }
 0x373   : > { %1017 = vmatpush1.bf16.msra.mxu1 %v1497_v63  ;;  %1362 = vmatprep.subr.mxu0 %v1092_v12  ;;  %v967_v49 = vld [vmem:[%s1903_s28] sm:$0x3] }
 0x374   : > { %1363 = vmatpush3.msra.mxu0 %v1076_v13  ;;  %v972_v52 = vrot.slane %v967_v49, %v971_v48  ;;  %v976_v54 = vrot.slane %v967_v49, %v975_v50 }
 0x375   : > { %1364 = vmatprep.subr.mxu0 %v1091_v14 }
 0x376   : > { %1365 = vmatpush3.msra.mxu0 %v1075_v15 }
 0x377   : > { %1366 = vmatprep.subr.mxu0 %v1090_v16 }
 0x378   : > { %1367 = vmatpush3.msra.mxu0 %v1074_v17 }
 0x379   : > { %1368 = vmatprep.subr.mxu0 %v1089_v18 }
 0x37a   : > { %1369 = vmatpush3.msra.mxu0 %v1073_v19 }
 0x37b   : > { %1370 = vmatprep.subr.mxu0 %v1088_v20 }
 0x37c   : > { %1371 = vmatpush3.msra.mxu0 %v1072_v21 }
 0x37d   : > { %1372 = vmatprep.subr.mxu0 %v1087_v22 }
 0x37e   : > { %1373 = vmatpush3.msra.mxu0 %v1071_v23 }
 0x37f   : > { %1374 = vmatprep.subr.mxu0 %v1086_v24 }
 0x380   : > { %1375 = vmatpush3.msra.mxu0 %v1070_v25 }
 0x381   : > { %1376 = vmatprep.subr.mxu0 %v1085_v26 }
 0x382   : > { %1377 = vmatpush3.msra.mxu0 %v1069_v27 }
 0x383   : > { %1378 = vmatprep.subr.mxu0 %v1084_v28 }
 0x384   : > { %1379 = vmatpush3.msra.mxu0 %v1068_v29 }
 0x385   : > { %1380 = vmatprep.subr.mxu0 %v1083_v38 }
 0x386   : > { %1381 = vmatpush3.msra.mxu0 %v1067_v39 }
 0x387   : > { %1382 = vmatprep.subr.mxu0 %v1082_v40 }
 0x388   : > { %1383 = vmatpush3.msra.mxu0 %v1066_v41 }
 0x389   : > { %1384 = vmatprep.subr.mxu0 %v1081_v42 }
 0x38a   : > { %1385 = vmatpush3.msra.mxu0 %v1065_v43 }
 0x3e6   : > { %v1052_v46 = vpop.permute.xlu0 %1051 }
 0x3e7   : > { %vm1054_vm8 = vcmp.ge.s32.totalorder %v1048_v51, %v1052_v46  ;;  %vm1053_vm9 = vcmp.ge.s32.totalorder %v1047_v47, %v1052_v46 }
 0x3eb   : > { %v1058_v53 = vpop.permute.xlu0 %1057 }
 0x3ec   : > { %vm1060_vm7 = vcmp.lt.s32.totalorder %v1048_v51, %v1058_v53  ;;  %vm1059_vm10 = vcmp.lt.s32.totalorder %v1047_v47, %v1058_v53 }
 0x3ed   : > { %vm1062_vm11 = vmand %vm1054_vm8, %vm1060_vm7 }
 0x3ee   : > { %vm1061_vm12 = vmand %vm1053_vm9, %vm1059_vm10 }
 0x42e   : > { %v955_v31 = vpop.f32.mrf.mxu1 }
 0x42f   : > { %v956_v32 = vadd.f32 %v1324_v30, %v955_v31 }
 0x430   : > { %v1433_v33 = vpop.f32.mrf.mxu1 }
 0x431   : > { %v961_v34 = vmax.f32 %v956_v32, 0.0 }
 0x432   : > { %v958_v35 = vpop.f32.mrf.mxu1 }
 0x433   : > { %v962_v36 = vpack.c.bf16 %v961_v34, %v961_v34 }
 0x434   : > { %v1434_v37 = vpop.f32.mrf.mxu1 }
 0x435   : > { %1332 = vmatmul.mubr.msk.bf16.vlgmr.msra.gmra.mxu1 %vm778_vm4, %v962_v36 }
 0x4f5   : > { %v1036_v55 = vpop.f32.mrf.mxu1 }
 0x4f6   : > { %v1037_v56 = vadd.f32 %v1036_v55, %v972_v52 }
 0x4f7   : > { %v1038_v57 = vpop.f32.mrf.mxu1 }
 0x4f8   : > { %1043 = vst [vmem:[%s1693_s1] sm:$0xff] %v1037_v56  ;;  %v1039_v58 = vadd.f32 %v1038_v57, %v976_v54 }
 0x4f9   : > { %v1040_v59 = vpop.f32.mrf.mxu1 }
 0x4fa   : > { %1044 = vst [vmem:[%s1693_s1 + $0x8] sm:$0xff] %v1039_v58  ;;  %1333 = vmatprep.mubr.msk.f32.mxu0 %vm1062_vm11, %v1039_v58 }
 0x4fb   : > { %v1041_v60 = vpop.f32.mrf.mxu1  ;;  %1334 = vmatmul.mubr.msk.f32.vlgmr.msra.gmra.mxu0 %vm1061_vm12, %v1037_v56 }
 0x5bb   : > { %v1386_v61 = vpop.f32.mrf.mxu0 }
 0x5bd   : > { %v1387_v62 = vpop.f32.mrf.mxu0 }
 0x5be   : > { %v1388_v63 = vadd.f32 %v1387_v62, %v1386_v61 }
 0x5c0   : > { %v1167_v0 = vand.u32 2147483647, %v1388_v63 }
 0x5c2   : > { %v1168_v1 = vsub.f32 0.0, %v1167_v0 }
 0x5c4   : > { %1169 = vst [vmem:[%s1688_s25] sm:$0xff] %v1168_v1 }
 0x5c5 PF: > { %s1904_s20 = sld [smem:[#allocation5_spill]] }
 0x5c6   : > { %s1905_s29 = sld [smem:[#allocation3_spill]] }
 0x5c7   : > { %s1906_s30 = sld [smem:[#allocation4_spill]] }
 0x5c8   : > { %s1907_s15 = sld [smem:[#allocation6_spill]] }
 0x5c9   : > { %s1908_s16 = sld [smem:[#allocation7_spill]] }
 0x5cb   : > { %s25_s17 = sadd.s32 1, %s1904_s20  }
 0x5cc   : > { %p22_p9 = scmp.ge.s32.totalorder %s25_s17, 34  }
 0x5ce   :  { %24 = sbr.rel (!%p22_p9) target bundleno = 4 (0x4), region = 128 }

</bundles_post_ra>
